<compile_context>
chip_gen: v7x
topology: tpu7x:2x2x1
jax: 0.10.0
libtpu: 0.0.40
codegen_flags: <defaults>
</compile_context>

<pallas_src>
import functools
import math

import jax
import jax.numpy as jnp
from jax.experimental import pallas as pl
from jax.experimental.pallas import tpu as pltpu


def _round_up(a: int, b: int) -> int:
    return ((a + b - 1) // b) * b


# --------------------------------------------------------------------------
# Kernel
# --------------------------------------------------------------------------
def _gru_kernel(xs_ref, hs_ref, wx_ref, wh_ref, o_ref):
    xs = xs_ref[...]                       # (tq, PACK*F_in)  bf16
    hs = hs_ref[...]                       # (tq, H)          bf16, H = PACK*F_hid
    H = hs.shape[-1]

    # Two fused matmuls covering all three gates (N = 3*H, lane-dense).
    gx = jnp.dot(xs, wx_ref[...], preferred_element_type=jnp.float32)  # (tq, 3H)
    gh = jnp.dot(hs, wh_ref[...], preferred_element_type=jnp.float32)  # (tq, 3H)

    # Update + reset gates with a single wide sigmoid slab (one EUP pass over
    # 2*H lanes); the H-aligned slices are vreg-aligned when H == 128.
    zr = jax.nn.sigmoid(gx[:, : 2 * H] + gh[:, : 2 * H])
    z_t = zr[:, :H]
    r_t = zr[:, H:]

    # Candidate state: reset gate scales only the hidden contribution.
    h_t = jnp.tanh(gx[:, 2 * H:] + r_t * gh[:, 2 * H:])

    h_f32 = hs.astype(jnp.float32)
    o_ref[...] = ((1.0 - z_t) * h_t + z_t * h_f32).astype(o_ref.dtype)


# --------------------------------------------------------------------------
# Weight packing (wrapper-side, done once)
# --------------------------------------------------------------------------
def pack_gru_weights(wzx, wrx, whx, wzh, wrh, whh, pack, dtype=jnp.bfloat16):
    """Build fused block-diagonal weights for the packed-row layout.

    Each w?? is (in_features, out_features), i.e. the transpose of the
    PyTorch Linear weight, so the kernel computes x @ W.

    Column layout of the result:  [ z-block | r-block | h-block ], each block
    pack*f_hid wide; within a block, packed row p occupies columns
    [p*f_hid, (p+1)*f_hid) and only reads input slice [p*f, (p+1)*f).
    """
    f_in, f_hid = wzx.shape

    def build(gate_ws, f):
        big = jnp.zeros((pack * f, 3 * pack * f_hid), jnp.float32)
        for g, w in enumerate(gate_ws):
            for p in range(pack):
                big = big.at[p * f:(p + 1) * f,
                             g * pack * f_hid + p * f_hid:
                             g * pack * f_hid + (p + 1) * f_hid].set(w)
        return big.astype(dtype)

    wx_big = build((wzx, wrx, whx), f_in)
    wh_big = build((wzh, wrh, whh), f_hid)
    return wx_big, wh_big


# --------------------------------------------------------------------------
# Wrapper
# --------------------------------------------------------------------------
@functools.partial(jax.jit, static_argnames=("pack", "max_tq"))
def gru_forward(x, h, wx_big, wh_big, *, pack, max_tq=512):
    """x: (..., F_in), h: (..., F_hid). wx_big/wh_big from pack_gru_weights."""
    f_in = x.shape[-1]
    f_hid = h.shape[-1]
    lead_shape = h.shape[:-1]
    assert x.shape[:-1] == lead_shape
    M = math.prod(lead_shape) if lead_shape else 1

    H = pack * f_hid            # packed hidden lane width (128 when f_hid | 128)
    Kx = pack * f_in            # packed input lane width

    # ---- choose packed-row tile; keep >= 2 grid steps when possible so both
    # v7x TensorCores get work, pad M so no divisibility assumption is needed.
    Q = _round_up(M, pack) // pack
    tq = max_tq
    if Q <= tq:
        tq = max(8, _round_up((Q + 1) // 2, 8))
    Q_pad = _round_up(Q, tq)
    M_pad = Q_pad * pack

    x2 = x.reshape(M, f_in)
    h2 = h.reshape(M, f_hid)
    if M_pad != M:
        x2 = jnp.pad(x2, ((0, M_pad - M), (0, 0)))
        h2 = jnp.pad(h2, ((0, M_pad - M), (0, 0)))

    # Row-packing reshapes are free (row-major contiguous). bf16 for the MXU.
    xs = x2.reshape(Q_pad, Kx).astype(jnp.bfloat16)
    hs = h2.reshape(Q_pad, H).astype(jnp.bfloat16)

    out = pl.pallas_call(
        _gru_kernel,
        out_shape=jax.ShapeDtypeStruct((Q_pad, H), jnp.float32),
        grid_spec=pltpu.PrefetchScalarGridSpec(
            num_scalar_prefetch=0,
            grid=(Q_pad // tq,),
            in_specs=[
                pl.BlockSpec((tq, Kx), lambda i: (i, 0)),
                pl.BlockSpec((tq, H), lambda i: (i, 0)),
                pl.BlockSpec((Kx, 3 * H), lambda i: (0, 0)),   # resident weights
                pl.BlockSpec((H, 3 * H), lambda i: (0, 0)),
            ],
            out_specs=pl.BlockSpec((tq, H), lambda i: (i, 0)),
        ),
        compiler_params=pltpu.CompilerParams(
            dimension_semantics=("parallel",),
            vmem_limit_bytes=32 * 1024 * 1024,
        ),
    )(xs, hs, wx_big, wh_big)

    out = out.reshape(M_pad, f_hid)[:M]
    return out.reshape(*lead_shape, f_hid)


# --------------------------------------------------------------------------
# Reference + init helpers
# --------------------------------------------------------------------------
def _init_linear_weight(key, n_in, n_out):
    """nn.Linear-style init; returned as (in, out) so kernels compute x @ W."""
    bound = 1.0 / jnp.sqrt(jnp.float32(n_in))
    w = jax.random.uniform(key, (n_out, n_in), jnp.float32, -bound, bound)
    return w.T


def gru_reference(x, h, wzx, wzh, wrx, wrh, whx, whh,
                  compute_dtype=jnp.bfloat16):
    """Pure-JAX reference with the same bf16-matmul / f32-accumulate recipe."""
    xd = x.astype(compute_dtype)
    hd = h.astype(compute_dtype)

    def mm(a, w):
        return jnp.dot(a, w.astype(compute_dtype),
                       preferred_element_type=jnp.float32)

    z_t = jax.nn.sigmoid(mm(xd, wzx) + mm(hd, wzh))
    r_t = jax.nn.sigmoid(mm(xd, wrx) + mm(hd, wrh))
    h_t = jnp.tanh(mm(xd, whx) + r_t * mm(hd, whh))
    return (1.0 - z_t) * h_t + z_t * hd.astype(jnp.float32)


# --------------------------------------------------------------------------
if __name__ == "__main__":
    # Spatial-temporal-GNN-like shapes: batch=2, seq=8, n_nodes=16,
    # n_input=n_hidden=32.  The GRU gating is applied per (batch, step, node)
    # row, exactly as the PyTorch module (nn.Linear broadcasts over leading
    # dims; this module has no recurrence inside forward).
    batch, seq, n_nodes = 2, 8, 16
    n_input, n_hidden = 32, 32

    key = jax.random.PRNGKey(0)
    kx, kh, k0, k1, k2, k3, k4, k5 = jax.random.split(key, 8)

    x = jax.random.normal(kx, (batch, seq, n_nodes, n_input), jnp.float32)
    h = jax.random.normal(kh, (batch, seq, n_nodes, n_hidden), jnp.float32)

    wzx = _init_linear_weight(k0, n_input, n_hidden)
    wzh = _init_linear_weight(k1, n_hidden, n_hidden)
    wrx = _init_linear_weight(k2, n_input, n_hidden)
    wrh = _init_linear_weight(k3, n_hidden, n_hidden)
    whx = _init_linear_weight(k4, n_input, n_hidden)
    whh = _init_linear_weight(k5, n_hidden, n_hidden)

    # Row-packing factor: pack PACK rows into the 128-lane dim when possible.
    pack = 128 // n_hidden if 128 % n_hidden == 0 else 1

    wx_big, wh_big = pack_gru_weights(wzx, wrx, whx, wzh, wrh, whh, pack)

    out = gru_forward(x, h, wx_big, wh_big, pack=pack)
    out = jax.block_until_ready(out)

    ref = gru_reference(
        x.reshape(-1, n_input), h.reshape(-1, n_hidden),
        wzx, wzh, wrx, wrh, whx, whh,
    ).reshape(batch, seq, n_nodes, n_hidden)

    assert out.shape == ref.shape
    assert jnp.allclose(out, ref, atol=1e-4, rtol=1e-3), "mismatch vs reference"

    print("KERNEL_OK")
</pallas_src>

<mosaic_0001>
module attributes {stable_mosaic.version = 11 : i64} {
  func.func @_gru_kernel(%arg0: i32, %arg1: memref<32x128xbf16, #tpu.memory_space<vmem>>, %arg2: memref<32x128xbf16, #tpu.memory_space<vmem>>, %arg3: memref<128x384xbf16, #tpu.memory_space<vmem>>, %arg4: memref<128x384xbf16, #tpu.memory_space<vmem>>, %arg5: memref<32x128xf32, #tpu.memory_space<vmem>>) attributes {dimension_semantics = [#tpu.dimension_semantics<parallel>], iteration_bounds = array<i64: 2>, scalar_prefetch = 0 : i64, scratch_operands = 0 : i64, tpu.core_type = #tpu.core_type<tc>, window_params = [{transform_indices = @transform_0, window_bounds = array<i64: 32, 128>}, {transform_indices = @transform_1, window_bounds = array<i64: 32, 128>}, {pipeline_mode = #tpu.pipeline_mode<synchronous>, transform_indices = @transform_2, window_bounds = array<i64: 128, 384>}, {pipeline_mode = #tpu.pipeline_mode<synchronous>, transform_indices = @transform_3, window_bounds = array<i64: 128, 384>}, {transform_indices = @transform_4, window_bounds = array<i64: 32, 128>}]} {
    %c0 = arith.constant 0 : index
    %c0_0 = arith.constant 0 : index
    %0 = vector.load %arg1[%c0, %c0_0] : memref<32x128xbf16, #tpu.memory_space<vmem>>, vector<32x128xbf16>
    %c0_1 = arith.constant 0 : index
    %c0_2 = arith.constant 0 : index
    %1 = vector.load %arg2[%c0_1, %c0_2] : memref<32x128xbf16, #tpu.memory_space<vmem>>, vector<32x128xbf16>
    %c0_3 = arith.constant 0 : index
    %c0_4 = arith.constant 0 : index
    %2 = vector.load %arg3[%c0_3, %c0_4] : memref<128x384xbf16, #tpu.memory_space<vmem>>, vector<128x384xbf16>
    %cst = arith.constant dense<0.000000e+00> : vector<32x384xf32>
    %3 = tpu.matmul %0, %2, %cst {dimension_numbers = #tpu.dot_dimension_numbers<[1], [0], [0], [1], [0, 0, 1, 1], [], []>} : vector<32x128xbf16>, vector<128x384xbf16>, vector<32x384xf32> -> vector<32x384xf32>
    %c0_5 = arith.constant 0 : index
    %c0_6 = arith.constant 0 : index
    %4 = vector.load %arg4[%c0_5, %c0_6] : memref<128x384xbf16, #tpu.memory_space<vmem>>, vector<128x384xbf16>
    %cst_7 = arith.constant dense<0.000000e+00> : vector<32x384xf32>
    %5 = tpu.matmul %1, %4, %cst_7 {dimension_numbers = #tpu.dot_dimension_numbers<[1], [0], [0], [1], [0, 0, 1, 1], [], []>} : vector<32x128xbf16>, vector<128x384xbf16>, vector<32x384xf32> -> vector<32x384xf32>
    %6 = vector.extract_strided_slice %3 {offsets = [0, 0], sizes = [32, 256], strides = [1, 1]} : vector<32x384xf32> to vector<32x256xf32>
    %7 = vector.extract_strided_slice %5 {offsets = [0, 0], sizes = [32, 256], strides = [1, 1]} : vector<32x384xf32> to vector<32x256xf32>
    %8 = arith.addf %6, %7 : vector<32x256xf32>
    %9 = arith.negf %8 : vector<32x256xf32>
    %10 = math.exp %9 : vector<32x256xf32>
    %cst_8 = arith.constant 1.000000e+00 : f32
    %11 = vector.broadcast %cst_8 : f32 to vector<32x256xf32>
    %12 = arith.addf %11, %10 : vector<32x256xf32>
    %13 = arith.divf %11, %12 : vector<32x256xf32>
    %14 = vector.extract_strided_slice %13 {offsets = [0, 0], sizes = [32, 128], strides = [1, 1]} : vector<32x256xf32> to vector<32x128xf32>
    %15 = vector.extract_strided_slice %13 {offsets = [0, 128], sizes = [32, 128], strides = [1, 1]} : vector<32x256xf32> to vector<32x128xf32>
    %16 = vector.extract_strided_slice %3 {offsets = [0, 256], sizes = [32, 128], strides = [1, 1]} : vector<32x384xf32> to vector<32x128xf32>
    %17 = vector.extract_strided_slice %5 {offsets = [0, 256], sizes = [32, 128], strides = [1, 1]} : vector<32x384xf32> to vector<32x128xf32>
    %18 = arith.mulf %15, %17 : vector<32x128xf32>
    %19 = arith.addf %16, %18 : vector<32x128xf32>
    %20 = math.tanh %19 : vector<32x128xf32>
    %21 = arith.extf %1 : vector<32x128xbf16> to vector<32x128xf32>
    %cst_9 = arith.constant 1.000000e+00 : f32
    %22 = vector.broadcast %cst_9 : f32 to vector<32x128xf32>
    %23 = arith.subf %22, %14 : vector<32x128xf32>
    %24 = arith.mulf %23, %20 : vector<32x128xf32>
    %25 = arith.mulf %14, %21 : vector<32x128xf32>
    %26 = arith.addf %24, %25 : vector<32x128xf32>
    %c0_10 = arith.constant 0 : index
    %c0_11 = arith.constant 0 : index
    %27 = vector.load %arg5[%c0_10, %c0_11] : memref<32x128xf32, #tpu.memory_space<vmem>>, vector<32x128xf32>
    tpu.vector_store %arg5[%c0_10, %c0_11], %26 {strides = array<i32>} : memref<32x128xf32, #tpu.memory_space<vmem>>, vector<32x128xf32>,
    return
  }
  func.func @transform_0(%arg0: i32) -> (i32, i32) {
    %c0_i32 = arith.constant 0 : i32
    %c0_i32_0 = arith.constant 0 : i32
    return %arg0, %c0_i32 : i32, i32
  }
  func.func @transform_1(%arg0: i32) -> (i32, i32) {
    %c0_i32 = arith.constant 0 : i32
    %c0_i32_0 = arith.constant 0 : i32
    return %arg0, %c0_i32 : i32, i32
  }
  func.func @transform_2(%arg0: i32) -> (i32, i32) {
    %c0_i32 = arith.constant 0 : i32
    %c0_i32_0 = arith.constant 0 : i32
    %c0_i32_1 = arith.constant 0 : i32
    return %c0_i32, %c0_i32_0 : i32, i32
  }
  func.func @transform_3(%arg0: i32) -> (i32, i32) {
    %c0_i32 = arith.constant 0 : i32
    %c0_i32_0 = arith.constant 0 : i32
    %c0_i32_1 = arith.constant 0 : i32
    return %c0_i32, %c0_i32_0 : i32, i32
  }
  func.func @transform_4(%arg0: i32) -> (i32, i32) {
    %c0_i32 = arith.constant 0 : i32
    %c0_i32_0 = arith.constant 0 : i32
    return %arg0, %c0_i32 : i32, i32
  }
}

</mosaic_0001>

<bundles_post_ra>
// kernel: gru_forward.1
= control target key start
LH: loop header
LB: loop body
LE: loop exit
PB: predicated region body
PF: predicated region fallthrough
CT: control target
= control target key end

     0   :  { %s1234_s15 = smov 0   ;;  %s1442_s0 = inlined_call_operand.vmem [shape: bf16[64,128], index: 0, kind: input, shape index: {}]   ;;  %s1443_s1 = inlined_call_operand.vmem [shape: bf16[64,128], index: 1, kind: input, shape index: {}]   ;;  %s1444_s2 = inlined_call_operand.vmem [shape: bf16[128,384], index: 2, kind: input, shape index: {}]   ;;  %s1445_s3 = inlined_call_operand.vmem [shape: bf16[128,384], index: 3, kind: input, shape index: {}]   ;;  %s1446_s4 = inlined_call_operand.vmem [shape: f32[64,128], index: 4, kind: output, shape index: {}]  }
   0x1 LB: > { %s940_s16 = sadd.s32 4294967295, %s1206_s15   ;;  %p944_p0 = scmp.ge.s32.totalorder %s1206_s15, 1  ;;  %s1206_s15 = sphi %s1234_s15, %s14_s15  }
   0x2   : > { %p174_p1 = scmp.lt.s32.totalorder %s1206_s15, 3 }
   0x4   : > { %p175_p2 = pnand %p944_p0, %p174_p1 }
   0x5   : > { %v1090_v0 = vld [vmem:[%s1444_s2 + $0x4] ss:$12 sps:$4 sm:$0xff] (!%p175_p2)   ;;  %s945_s19 = sshll.u32 (!%p175_p2), %s940_s16, 2  ;;  %v1092_v1 = vld [vmem:[%s1444_s2] ss:$12 sps:$4 sm:$0xff] (!%p175_p2)   ;;  %v1208_v2 = vmov (!%p175_p2), 0  }
   0x6   : > { %178 = sbr.rel (%p175_p2) target bundleno = 339 (0x153), region = 36  ;;  %436 = vmatprep.mubr.bf16.mxu0 (!%p175_p2), %v1208_v2  ;;  %p206_p3 = scmp.lt.s32.totalorder (!%p175_p2), %s945_s19, 7  ;;  %404 = vmatprep.subr.bf16.mxu0 (!%p175_p2), %v1090_v0  ;;  %v1093_v3 = vld [vmem:[%s1444_s2 + $0x1c] ss:$12 sps:$4 sm:$0xff] (!%p175_p2)   ;;  %v1095_v4 = vld [vmem:[%s1444_s2 + $0x18] ss:$12 sps:$4 sm:$0xff] (!%p175_p2)  }
   0x7   : > { %405 = vmatpush1.bf16.msra.mxu0 (!%p175_p2), %v1092_v1  ;;  %v1096_v5 = vld [vmem:[%s1444_s2 + $0x34] ss:$12 sps:$4 sm:$0xff] (!%p175_p2)   ;;  %v1098_v6 = vld [vmem:[%s1444_s2 + $0x30] ss:$12 sps:$4 sm:$0xff] (!%p175_p2)   ;;  %v1099_v7 = vld [vmem:[%s1444_s2 + $0x4c] ss:$12 sps:$4 sm:$0xff] (!%p175_p2)  }
   0x8   : > { %406 = vmatprep.subr.bf16.mxu0 (!%p175_p2), %v1093_v3  ;;  %v1111_v8 = vld [vmem:[%s1444_s2 + $0x8] ss:$12 sps:$4 sm:$0xff] (!%p175_p2)   ;;  %v1102_v10 = vld [vmem:[%s1444_s2 + $0x64] ss:$12 sps:$4 sm:$0xff] (!%p175_p2)   ;;  %v1115_v11 = vld [vmem:[%s1444_s2 + $0x20] ss:$12 sps:$4 sm:$0xff] (!%p175_p2)  }
   0x9   : > { %v1101_v9 = vld [vmem:[%s1444_s2 + $0x48] ss:$12 sps:$4 sm:$0xff] (!%p175_p2)   ;;  %1033 = vmatprep.subr.bf16.mxu1 (!%p175_p2), %v1111_v8  ;;  %v1104_v12 = vld [vmem:[%s1444_s2 + $0x60] ss:$12 sps:$4 sm:$0xff] (!%p175_p2)   ;;  %v1120_v14 = vld [vmem:[%s1444_s2 + $0x38] ss:$12 sps:$4 sm:$0xff] (!%p175_p2)  }
   0xa   : > { %1034 = vmatpush3.bf16.msra.mxu1 (!%p175_p2), %v1111_v8  ;;  %v1105_v15 = vld [vmem:[%s1444_s2 + $0x7c] ss:$12 sps:$4 sm:$0xff] (!%p175_p2)   ;;  %v1107_v17 = vld [vmem:[%s1444_s2 + $0x78] ss:$12 sps:$4 sm:$0xff] (!%p175_p2)   ;;  %v1108_v18 = vld [vmem:[%s1444_s2 + $0x94] ss:$12 sps:$4 sm:$0xff] (!%p175_p2)  }
   0xb   : > { %407 = vmatpush1.bf16.msra.mxu0 (!%p175_p2), %v1095_v4  ;;  %1035 = vmatprep.subr.bf16.mxu1 (!%p175_p2), %v1115_v11  ;;  %v1124_v16 = vld [vmem:[%s1444_s2 + $0x50] ss:$12 sps:$4 sm:$0xff] (!%p175_p2)   ;;  %v1128_v19 = vld [vmem:[%s1444_s2 + $0x68] ss:$12 sps:$4 sm:$0xff] (!%p175_p2)   ;;  %v1112_v21 = vld [vmem:[%s1444_s2 + $0xac] ss:$12 sps:$4 sm:$0xff] (!%p175_p2)  }
   0xc   : > { %408 = vmatprep.subr.bf16.mxu0 (!%p175_p2), %v1096_v5  ;;  %v1110_v20 = vld [vmem:[%s1444_s2 + $0x90] ss:$12 sps:$4 sm:$0xff] (!%p175_p2)   ;;  %v1132_v22 = vld [vmem:[%s1444_s2 + $0x80] ss:$12 sps:$4 sm:$0xff] (!%p175_p2)   ;;  %v1114_v23 = vld [vmem:[%s1444_s2 + $0xa8] ss:$12 sps:$4 sm:$0xff] (!%p175_p2)  }
   0xd   : > { %s1448_s19 = smov (!%p206_p3, %s945_s19), 7  ;;  %v1118_v24 = vld [vmem:[%s1445_s3 + $0x4] ss:$12 sps:$4 sm:$0xff]   ;;  %v1116_v26 = vld [vmem:[%s1445_s3] ss:$12 sps:$4 sm:$0xff]  }
   0xe   : > { %s946_s6 = sshll.u32 %s1448_s19, 2  ;;  %1036 = vmatpush3.bf16.msra.mxu1 %v1115_v11  ;;  %v1136_v25 = vld [vmem:[%s1444_s2 + $0x98] ss:$12 sps:$4 sm:$0xff]   ;;  %v1123_v27 = vld [vmem:[%s1445_s3 + $0x1c] ss:$12 sps:$4 sm:$0xff]  }
   0xf   : > { %409 = vmatpush1.bf16.msra.mxu0 %v1098_v6  ;;  %s1281_s16 = scalar_lea.vmem %s1442_s0, %s946_s6  ;;  %1037 = vmatprep.subr.bf16.mxu1 %v1120_v14  ;;  %v1140_v28 = vld [vmem:[%s1444_s2 + $0xb0] ss:$12 sps:$4 sm:$0xff]   ;;  %v1121_v29 = vld [vmem:[%s1445_s3 + $0x18] ss:$12 sps:$4 sm:$0xff]   ;;  %v1127_v30 = vld [vmem:[%s1445_s3 + $0x34] ss:$12 sps:$4 sm:$0xff]   ;;  %s1347_s11 = scalar_lea.vmem %s1443_s1, %s946_s6 }
  0x10   : > { %410 = vmatprep.subr.bf16.mxu0 %v1099_v7  ;;  %v1119_v13 = vld [vmem:[%s1281_s16] sm:$0xff]   ;;  %v1141_v31 = vld [vmem:[%s1281_s16 + $0x8] sm:$0xff]   ;;  %v1125_v33 = vld [vmem:[%s1445_s3 + $0x30] ss:$12 sps:$4 sm:$0xff]  }
  0x11   : > { %1049 = vmatprep.mubr.bf16.mxu1 %v1119_v13  ;;  %v1145_v32 = vld [vmem:[%s1445_s3 + $0x8] ss:$12 sps:$4 sm:$0xff]   ;;  %v1131_v34 = vld [vmem:[%s1445_s3 + $0x4c] ss:$12 sps:$4 sm:$0xff]   ;;  %v1360_v35 = vld [vmem:[%s1347_s11] sm:$0xff]  }
  0x12   : > { %1038 = vmatpush3.bf16.msra.mxu1 %v1120_v14  ;;  %v1149_v36 = vld [vmem:[%s1445_s3 + $0x20] ss:$12 sps:$4 sm:$0xff]   ;;  %v1129_v37 = vld [vmem:[%s1445_s3 + $0x48] ss:$12 sps:$4 sm:$0xff]   ;;  %v1135_v38 = vld [vmem:[%s1445_s3 + $0x64] ss:$12 sps:$4 sm:$0xff]  }
  0x13   : > { %411 = vmatpush1.bf16.msra.mxu0 %v1101_v9  ;;  %1039 = vmatprep.subr.bf16.mxu1 %v1124_v16  ;;  %v1151_v39 = vld [vmem:[%s1445_s3 + $0x38] ss:$12 sps:$4 sm:$0xff]   ;;  %v1133_v40 = vld [vmem:[%s1445_s3 + $0x60] ss:$12 sps:$4 sm:$0xff]   ;;  %v1139_v41 = vld [vmem:[%s1445_s3 + $0x7c] ss:$12 sps:$4 sm:$0xff]  }
  0x14   : > { %412 = vmatprep.subr.bf16.mxu0 %v1102_v10  ;;  %v1152_v42 = vld [vmem:[%s1445_s3 + $0x50] ss:$12 sps:$4 sm:$0xff]   ;;  %v1137_v43 = vld [vmem:[%s1445_s3 + $0x78] ss:$12 sps:$4 sm:$0xff]   ;;  %v1144_v44 = vld [vmem:[%s1445_s3 + $0x94] ss:$12 sps:$4 sm:$0xff]  }
  0x15   : > { %v1154_v45 = vld [vmem:[%s1445_s3 + $0x68] ss:$12 sps:$4 sm:$0xff]   ;;  %v1142_v46 = vld [vmem:[%s1445_s3 + $0x90] ss:$12 sps:$4 sm:$0xff]   ;;  %v1148_v47 = vld [vmem:[%s1445_s3 + $0xac] ss:$12 sps:$4 sm:$0xff]  }
  0x16   : > { %1040 = vmatpush3.bf16.msra.mxu1 %v1124_v16  ;;  %v1155_v48 = vld [vmem:[%s1445_s3 + $0x80] ss:$12 sps:$4 sm:$0xff]   ;;  %v1146_v49 = vld [vmem:[%s1445_s3 + $0xa8] ss:$12 sps:$4 sm:$0xff]   ;;  %v1156_v50 = vld [vmem:[%s1445_s3 + $0x98] ss:$12 sps:$4 sm:$0xff]  }
  0x17   : > { %413 = vmatpush1.bf16.msra.mxu0 %v1104_v12  ;;  %1041 = vmatprep.subr.bf16.mxu1 %v1128_v19  ;;  %v1157_v51 = vld [vmem:[%s1445_s3 + $0xb0] ss:$12 sps:$4 sm:$0xff]   ;;  %v1415_v52 = vld [vmem:[%s1347_s11 + $0x8] sm:$0xff]   ;;  %s950_s11 = sshll.u32 %s1448_s19, 3 }
  0x18   : > { %414 = vmatprep.subr.bf16.mxu0 %v1105_v15  ;;  %s221_s30 = scalar_lea.vmem %s1446_s4, %s950_s11 }
  0x1a   : > { %1042 = vmatpush3.bf16.msra.mxu1 %v1128_v19 }
  0x1b   : > { %415 = vmatpush1.bf16.msra.mxu0 %v1107_v17  ;;  %1043 = vmatprep.subr.bf16.mxu1 %v1132_v22 }
  0x1c   : > { %416 = vmatprep.subr.bf16.mxu0 %v1108_v18 }
  0x1e   : > { %1044 = vmatpush3.bf16.msra.mxu1 %v1132_v22 }
  0x1f   : > { %417 = vmatpush1.bf16.msra.mxu0 %v1110_v20  ;;  %1045 = vmatprep.subr.bf16.mxu1 %v1136_v25 }
  0x20   : > { %418 = vmatprep.subr.bf16.mxu0 %v1112_v21 }
  0x22   : > { %1046 = vmatpush3.bf16.msra.mxu1 %v1136_v25  ;;  %v848_v25 = vunpack.c.l.bf16 %v1360_v35 }
  0x23   : > { %419 = vmatpush1.bf16.msra.mxu0 %v1114_v23  ;;  %1047 = vmatprep.subr.bf16.mxu1 %v1140_v28 }
  0x24   : > { %678 = vmatprep.subr.bf16.mxu0 %v1118_v24 }
  0x26   : > { %437 = vmatmul.mubr.bf16.vlgmr.msra.gmra.mrb[0].mxu0 %v1119_v13  ;;  %1048 = vmatpush3.bf16.msra.mxu1 %v1140_v28 }
  0x27   : > { %679 = vmatpush1.bf16.msra.mxu0 %v1116_v26  ;;  %446 = vmatprep.mubr.bf16.mxu0 %v1208_v2 }
  0x28   : > { %680 = vmatprep.subr.bf16.mxu0 %v1123_v27  ;;  %1053 = vmatprep.subr.bf16.mxu1 %v1145_v32 }
  0x29   : > { %1050 = vmatmul.mubr.bf16.vlgmr.msra.gmra.mrb[0].mxu1 %v1141_v31 }
  0x2a   : > { %1054 = vmatpush3.bf16.msra.mxu1 %v1145_v32  ;;  %1069 = vmatprep.mubr.bf16.mxu1 %v1360_v35 }
  0x2b   : > { %681 = vmatpush1.bf16.msra.mxu0 %v1121_v29  ;;  %1055 = vmatprep.subr.bf16.mxu1 %v1149_v36  ;;  %v849_v29 = vunpack.c.h.bf16 %v1360_v35 }
  0x2c   : > { %682 = vmatprep.subr.bf16.mxu0 %v1127_v30 }
  0x2e   : > { %447 = vmatmul.mubr.bf16.gmra.mrb[4].mxu0 %v1141_v31  ;;  %1056 = vmatpush3.bf16.msra.mxu1 %v1149_v36 }
  0x2f   : > { %683 = vmatpush1.bf16.msra.mxu0 %v1125_v33  ;;  %710 = vmatprep.mubr.bf16.mxu0 %v1208_v2 }
  0x30   : > { %684 = vmatprep.subr.bf16.mxu0 %v1131_v34  ;;  %1057 = vmatprep.subr.bf16.mxu1 %v1151_v39 }
  0x32   : > { %1058 = vmatpush3.bf16.msra.mxu1 %v1151_v39 }
  0x33   : > { %685 = vmatpush1.bf16.msra.mxu0 %v1129_v37  ;;  %1059 = vmatprep.subr.bf16.mxu1 %v1152_v42 }
  0x34   : > { %686 = vmatprep.subr.bf16.mxu0 %v1135_v38 }
  0x36   : > { %1060 = vmatpush3.bf16.msra.mxu1 %v1152_v42  ;;  %v851_v42 = vunpack.c.h.bf16 %v1415_v52 }
  0x37   : > { %687 = vmatpush1.bf16.msra.mxu0 %v1133_v40  ;;  %1061 = vmatprep.subr.bf16.mxu1 %v1154_v45 }
  0x38   : > { %688 = vmatprep.subr.bf16.mxu0 %v1139_v41  ;;  %v850_v41 = vunpack.c.l.bf16 %v1415_v52 }
  0x3a   : > { %1062 = vmatpush3.bf16.msra.mxu1 %v1154_v45 }
  0x3b   : > { %689 = vmatpush1.bf16.msra.mxu0 %v1137_v43  ;;  %1063 = vmatprep.subr.bf16.mxu1 %v1155_v48 }
  0x3c   : > { %690 = vmatprep.subr.bf16.mxu0 %v1144_v44 }
  0x3e   : > { %1064 = vmatpush3.bf16.msra.mxu1 %v1155_v48 }
  0x3f   : > { %691 = vmatpush1.bf16.msra.mxu0 %v1142_v46  ;;  %1065 = vmatprep.subr.bf16.mxu1 %v1156_v50 }
  0x40   : > { %692 = vmatprep.subr.bf16.mxu0 %v1148_v47 }
  0x42   : > { %1066 = vmatpush3.bf16.msra.mxu1 %v1156_v50 }
  0x43   : > { %693 = vmatpush1.bf16.msra.mxu0 %v1146_v49  ;;  %1067 = vmatprep.subr.bf16.mxu1 %v1157_v51 }
  0x46   : > { %711 = vmatmul.mubr.bf16.vlgmr.msra.gmra.mrb[0].mxu0 %v1360_v35  ;;  %1068 = vmatpush3.bf16.msra.mxu1 %v1157_v51 }
  0x47   : > { %720 = vmatprep.mubr.bf16.mxu0 %v1208_v2 }
  0x49   : > { %1070 = vmatmul.mubr.bf16.vlgmr.msra.gmra.mrb[4].mxu1 %v1415_v52 }
  0x4e   : > { %721 = vmatmul.mubr.bf16.gmra.mrb[4].mxu0 %v1415_v52 }
  0xfc   : > { %v1419_v53 = vpop.f32.mrb[0].mxu1 }
  0xfd   : > { %v1421_v54 = vpop.f32.mrb[1].mxu1 }
  0xfe   : > { %v1423_v55 = vpop.f32.mrb[2].mxu1 }
  0xff   : > { %v1425_v56 = vpop.f32.mrb[3].mxu1 }
 0x119   : > { %v712_v57 = vpop.f32.mrb[0].mxu0 }
 0x11a   : > { %v1003_v58 = vmul.f32 -1.442695, %v712_v57  ;;  %v714_v59 = vpop.f32.mrb[1].mxu0 }
 0x11b   : > { %v1004_v60 = vmul.f32 -1.442695, %v714_v59  ;;  %v716_v61 = vpop.f32.mrb[2].mxu0 }
 0x11c   : > { %1160 = vpow2.f32 %v1003_v58  ;;  %v1005_v62 = vmul.f32 -1.442695, %v716_v61  ;;  %v718_v63 = vpop.f32.mrb[3].mxu0  ;;  %v1071_v6 = vpop.f32.mrb[4].mxu1 }
 0x11d   : > { %1162 = vpow2.f32 %v1004_v60  ;;  %v1006_v0 = vmul.f32 -1.442695, %v718_v63  ;;  %v765_v9 = vpop.f32.mrb[5].mxu1 }
 0x11e   : > { %1164 = vpow2.f32 %v1005_v62  ;;  %v1072_v11 = vpop.f32.mrb[6].mxu1 }
 0x11f   : > { %1166 = vpow2.f32 %v1006_v0  ;;  %v768_v13 = vpop.f32.mrb[7].mxu1 }
 0x121   : > { %v722_v1 = vpop.f32.mrb[4].mxu0 }
 0x122   : > { %v1007_v2 = vmul.f32 -1.442695, %v722_v1  ;;  %v724_v3 = vpop.f32.mrb[5].mxu0 }
 0x123   : > { %v1008_v4 = vmul.f32 -1.442695, %v724_v3  ;;  %v726_v5 = vpop.f32.mrb[6].mxu0 }
 0x124   : > { %1168 = vpow2.f32 %v1007_v2  ;;  %v1009_v7 = vmul.f32 -1.442695, %v726_v5  ;;  %v728_v8 = vpop.f32.mrb[7].mxu0 }
 0x125   : > { %1170 = vpow2.f32 %v1008_v4  ;;  %v1010_v10 = vmul.f32 -1.442695, %v728_v8 }
 0x126   : > { %v1161_v12 = vpop.eup %1160  ;;  %1172 = vpow2.f32 %v1009_v7 }
 0x127   : > { %v1163_v14 = vpop.eup %1162  ;;  %v812_v15 = vadd.f32 1.0, %v1161_v12  ;;  %1174 = vpow2.f32 %v1010_v10 }
 0x128   : > { %v1165_v16 = vpop.eup %1164  ;;  %v813_v17 = vadd.f32 1.0, %v1163_v14 }
 0x129   : > { %v1167_v18 = vpop.eup %1166  ;;  %1176 = vrcp.f32 %v812_v15  ;;  %v814_v19 = vadd.f32 1.0, %v1165_v16 }
 0x12a   : > { %1178 = vrcp.f32 %v813_v17  ;;  %v815_v20 = vadd.f32 1.0, %v1167_v18 }
 0x12b   : > { %1180 = vrcp.f32 %v814_v19 }
 0x12c   : > { %1182 = vrcp.f32 %v815_v20 }
 0x12e   : > { %v1169_v21 = vpop.eup %1168 }
 0x12f   : > { %v1171_v22 = vpop.eup %1170  ;;  %v816_v23 = vadd.f32 1.0, %v1169_v21 }
 0x130   : > { %v1173_v24 = vpop.eup %1172  ;;  %v817_v26 = vadd.f32 1.0, %v1171_v22 }
 0x131   : > { %v1175_v27 = vpop.eup %1174  ;;  %1184 = vrcp.f32 %v816_v23  ;;  %v818_v28 = vadd.f32 1.0, %v1173_v24 }
 0x132   : > { %1186 = vrcp.f32 %v817_v26  ;;  %v819_v30 = vadd.f32 1.0, %v1175_v27 }
 0x133   : > { %v1177_v31 = vpop.eup %1176  ;;  %1188 = vrcp.f32 %v818_v28 }
 0x134   : > { %v1179_v32 = vpop.eup %1178  ;;  %v860_v33 = vmul.f32 %v1177_v31, %v848_v25  ;;  %1190 = vrcp.f32 %v819_v30  ;;  %v852_v57 = vsub.f32 1.0, %v1177_v31 }
 0x135   : > { %v1181_v34 = vpop.eup %1180  ;;  %v836_v36 = vmul.f32 %v1179_v32, %v765_v9 }
 0x136   : > { %v1183_v37 = vpop.eup %1182  ;;  %v861_v38 = vmul.f32 %v1181_v34, %v849_v29 }
 0x137   : > { %v840_v39 = vadd.f32 %v836_v36, %v1421_v54  ;;  %v837_v40 = vmul.f32 %v1183_v37, %v768_v13 }
 0x139   : > { %1192 = vtanh.f32 %v840_v39  ;;  %v841_v35 = vadd.f32 %v837_v40, %v1425_v56  ;;  %v853_v56 = vsub.f32 1.0, %v1181_v34 }
 0x13b   : > { %v1185_v43 = vpop.eup %1184  ;;  %1194 = vtanh.f32 %v841_v35 }
 0x13c   : > { %v1187_v44 = vpop.eup %1186  ;;  %v862_v45 = vmul.f32 %v1185_v43, %v850_v41 }
 0x13d   : > { %v1189_v46 = vpop.eup %1188  ;;  %v838_v47 = vmul.f32 %v1187_v44, %v1071_v6 }
 0x13e   : > { %v1191_v48 = vpop.eup %1190  ;;  %v863_v49 = vmul.f32 %v1189_v46, %v851_v42  ;;  %v855_v0 = vsub.f32 1.0, %v1189_v46 }
 0x13f   : > { %v842_v50 = vadd.f32 %v1419_v53, %v838_v47  ;;  %v839_v51 = vmul.f32 %v1191_v48, %v1072_v11  ;;  %v854_v53 = vsub.f32 1.0, %v1185_v43 }
 0x141   : > { %1196 = vtanh.f32 %v842_v50  ;;  %v843_v54 = vadd.f32 %v1423_v55, %v839_v51 }
 0x143   : > { %v1193_v58 = vpop.eup %1192  ;;  %1198 = vtanh.f32 %v843_v54 }
 0x144   : > { %v856_v52 = vmul.f32 %v1193_v58, %v852_v57 }
 0x145   : > { %v1195_v59 = vpop.eup %1194 }
 0x146   : > { %v864_v60 = vadd.f32 %v860_v33, %v856_v52  ;;  %v857_v61 = vmul.f32 %v1195_v59, %v853_v56 }
 0x148   : > { %868 = vst [vmem:[%s221_s30] sm:$0xff] %v864_v60  ;;  %v865_v62 = vadd.f32 %v861_v38, %v857_v61 }
 0x14a   : > { %869 = vst [vmem:[%s221_s30 + $0x8] sm:$0xff] %v865_v62 }
 0x14b   : > { %v1197_v63 = vpop.eup %1196 }
 0x14c   : > { %v858_v55 = vmul.f32 %v1197_v63, %v854_v53 }
 0x14d   : > { %v1199_v1 = vpop.eup %1198 }
 0x14e   : > { %v866_v2 = vadd.f32 %v862_v45, %v858_v55  ;;  %v859_v3 = vmul.f32 %v1199_v1, %v855_v0 }
 0x150   : > { %v867_v4 = vadd.f32 %v863_v49, %v859_v3  ;;  %870 = vst [vmem:[%s221_s30 + $0x10] sm:$0xff] %v866_v2 }
 0x152   : > { %871 = vst [vmem:[%s221_s30 + $0x18] sm:$0xff] %v867_v4 }
 0x153 PF: > { %s14_s15 = sadd.s32 1, %s1206_s15  }
 0x154   : > { %p11_p4 = scmp.ge.s32.totalorder %s14_s15, 4  }
 0x156   :  { %13 = sbr.rel (!%p11_p4) target bundleno = 1 (0x1), region = 69 }

</bundles_post_ra>
